<compile_context>
chip_gen: v5e
topology: v5e:2x2
jax: 0.10.0
libtpu: 0.0.40
codegen_flags: <defaults>
</compile_context>

<pallas_src>
import functools

import jax
import jax.numpy as jnp
from jax.experimental import pallas as pl
from jax.experimental.pallas import tpu as pltpu


def _proj_stats_kernel(x_ref, w1a_ref, w1g_ref, b1a_ref, b1g_ref, w2_ref, b2_ref,
                       y_ref, sum_ref, sq_ref,
                       *, num_spks, in_channels, t_total, t_tile, mxu_dtype):
    """Pass 1: pconv1 + GLU + pconv2 for one (batch, T-tile); accumulate stats.

    x_ref:   (F, tT)        input tile (leading batch dim squeezed)
    w1a_ref: (H, F) bf16    first half of pconv1 weight  (GLU "a" branch)
    w1g_ref: (H, F) bf16    second half of pconv1 weight (GLU gate branch)
    b1a_ref: (H, 1) f32     biases
    b1g_ref: (H, 1) f32
    w2_ref:  (S*F, H) bf16  pconv2 weight
    b2_ref:  (S*F, 1) f32   pconv2 bias
    y_ref:   (S*F, tT)      unnormalized pconv2 output tile
    sum_ref: (S, tT)        lane-wise running sum per speaker   (resident in t)
    sq_ref:  (S, tT)        lane-wise running sum-of-squares    (resident in t)
    """
    F = in_channels
    S = num_spks
    t_idx = pl.program_id(1)

    @pl.when(t_idx == 0)
    def _init():
        sum_ref[...] = jnp.zeros_like(sum_ref)
        sq_ref[...] = jnp.zeros_like(sq_ref)

    needs_mask = (t_total % t_tile) != 0  # static

    x = x_ref[...]                                              # (F, tT) f32
    if needs_mask:
        col = jax.lax.broadcasted_iota(jnp.int32, (1, t_tile), 1)
        valid = (t_idx * t_tile + col) < t_total                # (1, tT)
        x = jnp.where(valid, x, 0.0)

    xm = x.astype(mxu_dtype)
    # Split pconv1: never materialize the full (4*F*S, tT) pre-GLU tensor.
    a = jnp.dot(w1a_ref[...], xm, preferred_element_type=jnp.float32) + b1a_ref[...]
    g = jnp.dot(w1g_ref[...], xm, preferred_element_type=jnp.float32) + b1g_ref[...]
    u = a * jax.nn.sigmoid(g)                                   # (H, tT) f32

    y = jnp.dot(w2_ref[...], u.astype(mxu_dtype),
                preferred_element_type=jnp.float32) + b2_ref[...]   # (S*F, tT)

    y_ref[...] = y.astype(y_ref.dtype)

    # One-pass stats: lane-wise partial sums (final lane reduction is done once
    # in the wrapper on a tiny (B, S, tT) array).
    ym = jnp.where(valid, y, 0.0) if needs_mask else y
    psum = []
    psq = []
    for s in range(S):                                          # static unroll, S small
        ys = ym[s * F:(s + 1) * F, :]
        psum.append(jnp.sum(ys, axis=0, keepdims=True))         # (1, tT)
        psq.append(jnp.sum(ys * ys, axis=0, keepdims=True))     # (1, tT)
    sum_ref[...] += jnp.concatenate(psum, axis=0)               # (S, tT)
    sq_ref[...] += jnp.concatenate(psq, axis=0)


def _norm_affine_kernel(y_ref, scale_ref, shift_ref, o_ref):
    """Pass 2: folded GroupNorm affine, out = y * scale + shift (in place)."""
    o_ref[...] = (y_ref[...] * scale_ref[...] + shift_ref[...]).astype(o_ref.dtype)


def _pick_t_tile(T, requested=None, max_tile=1024):
    """Lane-dense T tile: full T if it fits, else a multiple of 128."""
    if requested is None:
        if T <= max_tile:
            return T
        requested = max_tile
    if requested >= T:
        return T
    return max(128, (requested // 128) * 128)


@functools.partial(jax.jit, static_argnames=("num_spks", "t_tile"))
def speaker_splitter(x, w1, b1, w2, b2, gamma, beta, *, num_spks, t_tile=None):
    """x: (B, F, T) float32 -> (B*num_spks, F, T) float32."""
    B, F, T = x.shape
    S = num_spks
    H = 2 * F * S                       # hidden_dim
    assert w1.shape == (2 * H, F) and b1.shape == (2 * H,)
    assert w2.shape == (F * S, H) and b2.shape == (F * S,)
    assert gamma.shape == (F,) and beta.shape == (F,)

    tT = _pick_t_tile(T, t_tile)
    nT = pl.cdiv(T, tT)

    mxu_dtype = jnp.bfloat16            # bf16 MXU inputs, f32 accumulation
    x = x.astype(jnp.float32)
    w1a = w1[:H].astype(mxu_dtype)      # GLU "a" branch weight
    w1g = w1[H:].astype(mxu_dtype)      # GLU gate branch weight
    b1a = b1[:H].reshape(H, 1).astype(jnp.float32)
    b1g = b1[H:].reshape(H, 1).astype(jnp.float32)
    w2c = w2.astype(mxu_dtype)
    b2c = b2.reshape(S * F, 1).astype(jnp.float32)

    # Rough per-step VMEM estimate (f32 intermediates + double-buffered tiles),
    # capped at 48 MiB so it remains valid on v7x (64 MiB physical per TC).
    tile_bytes = 4 * tT * (F + 3 * H + 2 * S * F + 2 * S)
    weight_bytes = 2 * H * (2 * F + S * F) + 4 * (2 * H + S * F)
    vmem_limit = int(min(max(4 * tile_bytes + weight_bytes, 32 << 20), 48 << 20))

    kernel1 = functools.partial(
        _proj_stats_kernel, num_spks=S, in_channels=F,
        t_total=T, t_tile=tT, mxu_dtype=mxu_dtype)

    y, lane_sum, lane_sq = pl.pallas_call(
        kernel1,
        out_shape=(
            jax.ShapeDtypeStruct((B, S * F, T), jnp.float32),   # unnormalized y
            jax.ShapeDtypeStruct((B, S, tT), jnp.float32),      # lane-wise sums
            jax.ShapeDtypeStruct((B, S, tT), jnp.float32),      # lane-wise sum sq
        ),
        grid_spec=pltpu.PrefetchScalarGridSpec(
            num_scalar_prefetch=0,
            grid=(B, nT),
            in_specs=[
                pl.BlockSpec((None, F, tT), lambda b, t: (b, 0, t)),   # x
                pl.BlockSpec((H, F), lambda b, t: (0, 0)),             # w1a
                pl.BlockSpec((H, F), lambda b, t: (0, 0)),             # w1g
                pl.BlockSpec((H, 1), lambda b, t: (0, 0)),             # b1a
                pl.BlockSpec((H, 1), lambda b, t: (0, 0)),             # b1g
                pl.BlockSpec((S * F, H), lambda b, t: (0, 0)),         # w2
                pl.BlockSpec((S * F, 1), lambda b, t: (0, 0)),         # b2
            ],
            out_specs=[
                pl.BlockSpec((None, S * F, tT), lambda b, t: (b, 0, t)),  # y tile
                pl.BlockSpec((None, S, tT), lambda b, t: (b, 0, 0)),      # sum acc
                pl.BlockSpec((None, S, tT), lambda b, t: (b, 0, 0)),      # sumsq acc
            ],
        ),
        compiler_params=pltpu.CompilerParams(
            dimension_semantics=("parallel", "arbitrary"),
            vmem_limit_bytes=vmem_limit),
    )(x, w1a, w1g, b1a, b1g, w2c, b2c)

    # Finish GroupNorm stats on the tiny (B, S, tT) accumulators and fold the
    # per-channel affine into one multiply+add per element.
    cnt = jnp.float32(F * T)
    tot = jnp.sum(lane_sum, axis=-1)                     # (B, S)
    tot_sq = jnp.sum(lane_sq, axis=-1)                   # (B, S)
    mean = tot / cnt
    var = jnp.maximum(tot_sq / cnt - mean * mean, 0.0)   # one-pass variance
    inv = jax.lax.rsqrt(var + 1e-8)                      # (B, S)
    scale = inv[:, :, None] * gamma[None, None, :]       # (B, S, F)
    shift = beta[None, None, :] - mean[:, :, None] * scale
    scale = scale.reshape(B, S * F, 1).astype(jnp.float32)
    shift = shift.reshape(B, S * F, 1).astype(jnp.float32)

    out = pl.pallas_call(
        _norm_affine_kernel,
        out_shape=jax.ShapeDtypeStruct((B, S * F, T), jnp.float32),
        grid_spec=pltpu.PrefetchScalarGridSpec(
            num_scalar_prefetch=0,
            grid=(B, nT),
            in_specs=[
                pl.BlockSpec((None, S * F, tT), lambda b, t: (b, 0, t)),  # y
                pl.BlockSpec((None, S * F, 1), lambda b, t: (b, 0, 0)),   # scale
                pl.BlockSpec((None, S * F, 1), lambda b, t: (b, 0, 0)),   # shift
            ],
            out_specs=pl.BlockSpec((None, S * F, tT), lambda b, t: (b, 0, t)),
        ),
        input_output_aliases={0: 0},   # normalize y in place, no extra HBM buffer
        compiler_params=pltpu.CompilerParams(
            dimension_semantics=("parallel", "parallel"),
            vmem_limit_bytes=vmem_limit),
    )(y, scale, shift)

    # (B, S*F, T) -> (B*S, F, T)  == torch .view(B*S, F, T) (speaker-major blocks)
    return out.reshape(B * S, F, T)


def _reference(x, w1, b1, w2, b2, gamma, beta, num_spks, eps=1e-8):
    """Pure-JAX f32 reference mirroring the PyTorch forward."""
    B, F, T = x.shape
    S = num_spks
    H = 2 * F * S
    prec = jax.lax.Precision.HIGHEST
    h = jnp.einsum("oi,bit->bot", w1, x, precision=prec) + b1[None, :, None]
    u = h[:, :H, :] * jax.nn.sigmoid(h[:, H:, :])
    y = jnp.einsum("oi,bit->bot", w2, u, precision=prec) + b2[None, :, None]
    y = y.reshape(B * S, F, T)
    mean = jnp.mean(y, axis=(1, 2), keepdims=True)
    var = jnp.mean((y - mean) ** 2, axis=(1, 2), keepdims=True)
    yn = (y - mean) / jnp.sqrt(var + eps)
    return yn * gamma[None, :, None] + beta[None, :, None]


if __name__ == "__main__":
    # Small shapes consistent with the module; T spans two tiles so the
    # cross-tile stats accumulation path is exercised.
    B = 2           # batch
    F = 16          # in_channels
    S = 2           # num_spks
    T = 256         # time steps (2 lane-dense tiles of 128)
    H = 2 * F * S   # hidden_dim

    key = jax.random.PRNGKey(0)
    kx, k1, k2, k3, k4 = jax.random.split(key, 5)

    x = jax.random.normal(kx, (B, F, T), dtype=jnp.float32)

    # Deterministic synthetic parameters (Conv1d kernel_size=1 -> squeeze last dim).
    w1 = 0.1 * jax.random.normal(k1, (2 * H, F), dtype=jnp.float32)
    b1 = 0.05 * jax.random.normal(k2, (2 * H,), dtype=jnp.float32)
    w2 = 0.1 * jax.random.normal(k3, (F * S, H), dtype=jnp.float32)
    b2 = 0.05 * jax.random.normal(k4, (F * S,), dtype=jnp.float32)
    gamma = jnp.linspace(0.5, 1.5, F, dtype=jnp.float32)   # GroupNorm weight
    beta = jnp.linspace(-0.1, 0.1, F, dtype=jnp.float32)   # GroupNorm bias

    out = speaker_splitter(x, w1, b1, w2, b2, gamma, beta, num_spks=S, t_tile=128)
    out = jax.block_until_ready(out)

    ref = _reference(x, w1, b1, w2, b2, gamma, beta, S)
    assert out.shape == (B * S, F, T), out.shape
    # bf16 MXU inputs (f32 accumulation) -> ~1% error after normalization.
    max_err = float(jnp.max(jnp.abs(out - ref)))
    assert jnp.allclose(out, ref, atol=2e-2, rtol=2e-2), max_err

    print("KERNEL_OK")
</pallas_src>

<mosaic_0001>
module attributes {stable_mosaic.version = 11 : i64} {
  func.func @_proj_stats_kernel(%arg0: i32, %arg1: i32, %arg2: memref<1x16x128xf32, #tpu.memory_space<vmem>>, %arg3: memref<64x16xbf16, #tpu.memory_space<vmem>>, %arg4: memref<64x16xbf16, #tpu.memory_space<vmem>>, %arg5: memref<64x1xf32, #tpu.memory_space<vmem>>, %arg6: memref<64x1xf32, #tpu.memory_space<vmem>>, %arg7: memref<32x64xbf16, #tpu.memory_space<vmem>>, %arg8: memref<32x1xf32, #tpu.memory_space<vmem>>, %arg9: memref<1x32x128xf32, #tpu.memory_space<vmem>>, %arg10: memref<1x2x128xf32, #tpu.memory_space<vmem>>, %arg11: memref<1x2x128xf32, #tpu.memory_space<vmem>>) attributes {dimension_semantics = [#tpu.dimension_semantics<parallel>, #tpu.dimension_semantics<arbitrary>], iteration_bounds = array<i64: 2, 2>, scalar_prefetch = 0 : i64, scratch_operands = 0 : i64, tpu.core_type = #tpu.core_type<tc>, window_params = [{transform_indices = @transform_0, window_bounds = array<i64: 1, 16, 128>}, {pipeline_mode = #tpu.pipeline_mode<synchronous>, transform_indices = @transform_1, window_bounds = array<i64: 64, 16>}, {pipeline_mode = #tpu.pipeline_mode<synchronous>, transform_indices = @transform_2, window_bounds = array<i64: 64, 16>}, {pipeline_mode = #tpu.pipeline_mode<synchronous>, transform_indices = @transform_3, window_bounds = array<i64: 64, 1>}, {pipeline_mode = #tpu.pipeline_mode<synchronous>, transform_indices = @transform_4, window_bounds = array<i64: 64, 1>}, {pipeline_mode = #tpu.pipeline_mode<synchronous>, transform_indices = @transform_5, window_bounds = array<i64: 32, 64>}, {pipeline_mode = #tpu.pipeline_mode<synchronous>, transform_indices = @transform_6, window_bounds = array<i64: 32, 1>}, {transform_indices = @transform_7, window_bounds = array<i64: 1, 32, 128>}, {transform_indices = @transform_8, window_bounds = array<i64: 1, 2, 128>}, {transform_indices = @transform_9, window_bounds = array<i64: 1, 2, 128>}]} {
    %c0_i32 = arith.constant 0 : i32
    %0 = arith.cmpi eq, %arg1, %c0_i32 : i32
    %1 = arith.extui %0 : i1 to i32
    %c0_i32_0 = arith.constant 0 : i32
    %2 = arith.cmpi ne, %1, %c0_i32_0 : i32
    scf.if %2 {
      %cst_37 = arith.constant 0.000000e+00 : f32
      %57 = vector.broadcast %cst_37 : f32 to vector<2x128xf32>
      %c0_38 = arith.constant 0 : index
      %c0_39 = arith.constant 0 : index
      %c0_40 = arith.constant 0 : index
      %58 = vector.load %arg10[%c0_38, %c0_39, %c0_40] : memref<1x2x128xf32, #tpu.memory_space<vmem>>, vector<1x2x128xf32>
      %59 = vector.shape_cast %58 : vector<1x2x128xf32> to vector<2x128xf32>
      %60 = vector.shape_cast %57 : vector<2x128xf32> to vector<1x2x128xf32>
      tpu.vector_store %arg10[%c0_38, %c0_39, %c0_40], %60 {strides = array<i32>} : memref<1x2x128xf32, #tpu.memory_space<vmem>>, vector<1x2x128xf32>,
      %cst_41 = arith.constant 0.000000e+00 : f32
      %61 = vector.broadcast %cst_41 : f32 to vector<2x128xf32>
      %c0_42 = arith.constant 0 : index
      %c0_43 = arith.constant 0 : index
      %c0_44 = arith.constant 0 : index
      %62 = vector.load %arg11[%c0_42, %c0_43, %c0_44] : memref<1x2x128xf32, #tpu.memory_space<vmem>>, vector<1x2x128xf32>
      %63 = vector.shape_cast %62 : vector<1x2x128xf32> to vector<2x128xf32>
      %64 = vector.shape_cast %61 : vector<2x128xf32> to vector<1x2x128xf32>
      tpu.vector_store %arg11[%c0_42, %c0_43, %c0_44], %64 {strides = array<i32>} : memref<1x2x128xf32, #tpu.memory_space<vmem>>, vector<1x2x128xf32>,
    } else {
    }
    %c0 = arith.constant 0 : index
    %c0_1 = arith.constant 0 : index
    %c0_2 = arith.constant 0 : index
    %3 = vector.load %arg2[%c0, %c0_1, %c0_2] : memref<1x16x128xf32, #tpu.memory_space<vmem>>, vector<1x16x128xf32>
    %4 = vector.shape_cast %3 : vector<1x16x128xf32> to vector<16x128xf32>
    %5 = arith.truncf %4 : vector<16x128xf32> to vector<16x128xbf16>
    %c0_3 = arith.constant 0 : index
    %c0_4 = arith.constant 0 : index
    %6 = vector.load %arg3[%c0_3, %c0_4] : memref<64x16xbf16, #tpu.memory_space<vmem>>, vector<64x16xbf16>
    %cst = arith.constant dense<0.000000e+00> : vector<64x128xf32>
    %7 = tpu.matmul %6, %5, %cst {dimension_numbers = #tpu.dot_dimension_numbers<[1], [0], [0], [1], [0, 0, 1, 1], [], []>} : vector<64x16xbf16>, vector<16x128xbf16>, vector<64x128xf32> -> vector<64x128xf32>
    %c0_5 = arith.constant 0 : index
    %c0_6 = arith.constant 0 : index
    %8 = vector.load %arg5[%c0_5, %c0_6] : memref<64x1xf32, #tpu.memory_space<vmem>>, vector<64x1xf32>
    %9 = vector.broadcast %8 : vector<64x1xf32> to vector<64x128xf32>
    %10 = arith.addf %7, %9 : vector<64x128xf32>
    %c0_7 = arith.constant 0 : index
    %c0_8 = arith.constant 0 : index
    %11 = vector.load %arg4[%c0_7, %c0_8] : memref<64x16xbf16, #tpu.memory_space<vmem>>, vector<64x16xbf16>
    %cst_9 = arith.constant dense<0.000000e+00> : vector<64x128xf32>
    %12 = tpu.matmul %11, %5, %cst_9 {dimension_numbers = #tpu.dot_dimension_numbers<[1], [0], [0], [1], [0, 0, 1, 1], [], []>} : vector<64x16xbf16>, vector<16x128xbf16>, vector<64x128xf32> -> vector<64x128xf32>
    %c0_10 = arith.constant 0 : index
    %c0_11 = arith.constant 0 : index
    %13 = vector.load %arg6[%c0_10, %c0_11] : memref<64x1xf32, #tpu.memory_space<vmem>>, vector<64x1xf32>
    %14 = vector.broadcast %13 : vector<64x1xf32> to vector<64x128xf32>
    %15 = arith.addf %12, %14 : vector<64x128xf32>
    %16 = arith.negf %15 : vector<64x128xf32>
    %17 = math.exp %16 : vector<64x128xf32>
    %cst_12 = arith.constant 1.000000e+00 : f32
    %18 = vector.broadcast %cst_12 : f32 to vector<64x128xf32>
    %19 = arith.addf %18, %17 : vector<64x128xf32>
    %20 = arith.divf %18, %19 : vector<64x128xf32>
    %21 = arith.mulf %10, %20 : vector<64x128xf32>
    %c0_13 = arith.constant 0 : index
    %c0_14 = arith.constant 0 : index
    %22 = vector.load %arg7[%c0_13, %c0_14] : memref<32x64xbf16, #tpu.memory_space<vmem>>, vector<32x64xbf16>
    %23 = arith.truncf %21 : vector<64x128xf32> to vector<64x128xbf16>
    %cst_15 = arith.constant dense<0.000000e+00> : vector<32x128xf32>
    %24 = tpu.matmul %22, %23, %cst_15 {dimension_numbers = #tpu.dot_dimension_numbers<[1], [0], [0], [1], [0, 0, 1, 1], [], []>} : vector<32x64xbf16>, vector<64x128xbf16>, vector<32x128xf32> -> vector<32x128xf32>
    %c0_16 = arith.constant 0 : index
    %c0_17 = arith.constant 0 : index
    %25 = vector.load %arg8[%c0_16, %c0_17] : memref<32x1xf32, #tpu.memory_space<vmem>>, vector<32x1xf32>
    %26 = vector.broadcast %25 : vector<32x1xf32> to vector<32x128xf32>
    %27 = arith.addf %24, %26 : vector<32x128xf32>
    %c0_18 = arith.constant 0 : index
    %c0_19 = arith.constant 0 : index
    %c0_20 = arith.constant 0 : index
    %28 = vector.load %arg9[%c0_18, %c0_19, %c0_20] : memref<1x32x128xf32, #tpu.memory_space<vmem>>, vector<1x32x128xf32>
    %29 = vector.shape_cast %28 : vector<1x32x128xf32> to vector<32x128xf32>
    %30 = vector.shape_cast %27 : vector<32x128xf32> to vector<1x32x128xf32>
    tpu.vector_store %arg9[%c0_18, %c0_19, %c0_20], %30 {strides = array<i32>} : memref<1x32x128xf32, #tpu.memory_space<vmem>>, vector<1x32x128xf32>,
    %31 = vector.extract_strided_slice %27 {offsets = [0, 0], sizes = [16, 128], strides = [1, 1]} : vector<32x128xf32> to vector<16x128xf32>
    %cst_21 = arith.constant dense<0.000000e+00> : vector<128xf32>
    %32 = vector.multi_reduction <add>, %31, %cst_21 [0] : vector<16x128xf32> to vector<128xf32>
    %33 = vector.shape_cast %32 : vector<128xf32> to vector<1x128xf32>
    %34 = arith.mulf %31, %31 : vector<16x128xf32>
    %cst_22 = arith.constant dense<0.000000e+00> : vector<128xf32>
    %35 = vector.multi_reduction <add>, %34, %cst_22 [0] : vector<16x128xf32> to vector<128xf32>
    %36 = vector.shape_cast %35 : vector<128xf32> to vector<1x128xf32>
    %37 = vector.extract_strided_slice %27 {offsets = [16, 0], sizes = [16, 128], strides = [1, 1]} : vector<32x128xf32> to vector<16x128xf32>
    %cst_23 = arith.constant dense<0.000000e+00> : vector<128xf32>
    %38 = vector.multi_reduction <add>, %37, %cst_23 [0] : vector<16x128xf32> to vector<128xf32>
    %39 = vector.shape_cast %38 : vector<128xf32> to vector<1x128xf32>
    %40 = arith.mulf %37, %37 : vector<16x128xf32>
    %cst_24 = arith.constant dense<0.000000e+00> : vector<128xf32>
    %41 = vector.multi_reduction <add>, %40, %cst_24 [0] : vector<16x128xf32> to vector<128xf32>
    %42 = vector.shape_cast %41 : vector<128xf32> to vector<1x128xf32>
    %c0_25 = arith.constant 0 : index
    %c0_26 = arith.constant 0 : index
    %c0_27 = arith.constant 0 : index
    %43 = vector.load %arg10[%c0_25, %c0_26, %c0_27] : memref<1x2x128xf32, #tpu.memory_space<vmem>>, vector<1x2x128xf32>
    %44 = vector.shape_cast %43 : vector<1x2x128xf32> to vector<2x128xf32>
    %45 = tpu.concatenate %33, %39 in 0 : vector<1x128xf32>, vector<1x128xf32> -> vector<2x128xf32>
    %46 = arith.addf %44, %45 : vector<2x128xf32>
    %c0_28 = arith.constant 0 : index
    %c0_29 = arith.constant 0 : index
    %c0_30 = arith.constant 0 : index
    %47 = vector.load %arg10[%c0_28, %c0_29, %c0_30] : memref<1x2x128xf32, #tpu.memory_space<vmem>>, vector<1x2x128xf32>
    %48 = vector.shape_cast %47 : vector<1x2x128xf32> to vector<2x128xf32>
    %49 = vector.shape_cast %46 : vector<2x128xf32> to vector<1x2x128xf32>
    tpu.vector_store %arg10[%c0_28, %c0_29, %c0_30], %49 {strides = array<i32>} : memref<1x2x128xf32, #tpu.memory_space<vmem>>, vector<1x2x128xf32>,
    %c0_31 = arith.constant 0 : index
    %c0_32 = arith.constant 0 : index
    %c0_33 = arith.constant 0 : index
    %50 = vector.load %arg11[%c0_31, %c0_32, %c0_33] : memref<1x2x128xf32, #tpu.memory_space<vmem>>, vector<1x2x128xf32>
    %51 = vector.shape_cast %50 : vector<1x2x128xf32> to vector<2x128xf32>
    %52 = tpu.concatenate %36, %42 in 0 : vector<1x128xf32>, vector<1x128xf32> -> vector<2x128xf32>
    %53 = arith.addf %51, %52 : vector<2x128xf32>
    %c0_34 = arith.constant 0 : index
    %c0_35 = arith.constant 0 : index
    %c0_36 = arith.constant 0 : index
    %54 = vector.load %arg11[%c0_34, %c0_35, %c0_36] : memref<1x2x128xf32, #tpu.memory_space<vmem>>, vector<1x2x128xf32>
    %55 = vector.shape_cast %54 : vector<1x2x128xf32> to vector<2x128xf32>
    %56 = vector.shape_cast %53 : vector<2x128xf32> to vector<1x2x128xf32>
    tpu.vector_store %arg11[%c0_34, %c0_35, %c0_36], %56 {strides = array<i32>} : memref<1x2x128xf32, #tpu.memory_space<vmem>>, vector<1x2x128xf32>,
    return
  }
  func.func @transform_0(%arg0: i32, %arg1: i32) -> (i32, i32, i32) {
    %c0_i32 = arith.constant 0 : i32
    %c0_i32_0 = arith.constant 0 : i32
    return %arg0, %c0_i32, %arg1 : i32, i32, i32
  }
  func.func @transform_1(%arg0: i32, %arg1: i32) -> (i32, i32) {
    %c0_i32 = arith.constant 0 : i32
    %c0_i32_0 = arith.constant 0 : i32
    %c0_i32_1 = arith.constant 0 : i32
    return %c0_i32, %c0_i32_0 : i32, i32
  }
  func.func @transform_2(%arg0: i32, %arg1: i32) -> (i32, i32) {
    %c0_i32 = arith.constant 0 : i32
    %c0_i32_0 = arith.constant 0 : i32
    %c0_i32_1 = arith.constant 0 : i32
    return %c0_i32, %c0_i32_0 : i32, i32
  }
  func.func @transform_3(%arg0: i32, %arg1: i32) -> (i32, i32) {
    %c0_i32 = arith.constant 0 : i32
    %c0_i32_0 = arith.constant 0 : i32
    %c0_i32_1 = arith.constant 0 : i32
    return %c0_i32, %c0_i32_0 : i32, i32
  }
  func.func @transform_4(%arg0: i32, %arg1: i32) -> (i32, i32) {
    %c0_i32 = arith.constant 0 : i32
    %c0_i32_0 = arith.constant 0 : i32
    %c0_i32_1 = arith.constant 0 : i32
    return %c0_i32, %c0_i32_0 : i32, i32
  }
  func.func @transform_5(%arg0: i32, %arg1: i32) -> (i32, i32) {
    %c0_i32 = arith.constant 0 : i32
    %c0_i32_0 = arith.constant 0 : i32
    %c0_i32_1 = arith.constant 0 : i32
    return %c0_i32, %c0_i32_0 : i32, i32
  }
  func.func @transform_6(%arg0: i32, %arg1: i32) -> (i32, i32) {
    %c0_i32 = arith.constant 0 : i32
    %c0_i32_0 = arith.constant 0 : i32
    %c0_i32_1 = arith.constant 0 : i32
    return %c0_i32, %c0_i32_0 : i32, i32
  }
  func.func @transform_7(%arg0: i32, %arg1: i32) -> (i32, i32, i32) {
    %c0_i32 = arith.constant 0 : i32
    %c0_i32_0 = arith.constant 0 : i32
    return %arg0, %c0_i32, %arg1 : i32, i32, i32
  }
  func.func @transform_8(%arg0: i32, %arg1: i32) -> (i32, i32, i32) {
    %c0_i32 = arith.constant 0 : i32
    %c0_i32_0 = arith.constant 0 : i32
    %c0_i32_1 = arith.constant 0 : i32
    return %arg0, %c0_i32, %c0_i32_0 : i32, i32, i32
  }
  func.func @transform_9(%arg0: i32, %arg1: i32) -> (i32, i32, i32) {
    %c0_i32 = arith.constant 0 : i32
    %c0_i32_0 = arith.constant 0 : i32
    %c0_i32_1 = arith.constant 0 : i32
    return %arg0, %c0_i32, %c0_i32_0 : i32, i32, i32
  }
}

module attributes {stable_mosaic.version = 11 : i64} {
  func.func @_norm_affine_kernel(%arg0: i32, %arg1: i32, %arg2: memref<1x32x128xf32, #tpu.memory_space<vmem>>, %arg3: memref<1x32x1xf32, #tpu.memory_space<vmem>>, %arg4: memref<1x32x1xf32, #tpu.memory_space<vmem>>, %arg5: memref<1x32x128xf32, #tpu.memory_space<vmem>>) attributes {dimension_semantics = [#tpu.dimension_semantics<parallel>, #tpu.dimension_semantics<parallel>], iteration_bounds = array<i64: 2, 2>, scalar_prefetch = 0 : i64, scratch_operands = 0 : i64, tpu.core_type = #tpu.core_type<tc>, window_params = [{transform_indices = @transform_0, window_bounds = array<i64: 1, 32, 128>}, {transform_indices = @transform_1, window_bounds = array<i64: 1, 32, 1>}, {transform_indices = @transform_2, window_bounds = array<i64: 1, 32, 1>}, {transform_indices = @transform_3, window_bounds = array<i64: 1, 32, 128>}]} {
    %c0 = arith.constant 0 : index
    %c0_0 = arith.constant 0 : index
    %c0_1 = arith.constant 0 : index
    %0 = vector.load %arg2[%c0, %c0_0, %c0_1] : memref<1x32x128xf32, #tpu.memory_space<vmem>>, vector<1x32x128xf32>
    %1 = vector.shape_cast %0 : vector<1x32x128xf32> to vector<32x128xf32>
    %c0_2 = arith.constant 0 : index
    %c0_3 = arith.constant 0 : index
    %c0_4 = arith.constant 0 : index
    %2 = vector.load %arg3[%c0_2, %c0_3, %c0_4] : memref<1x32x1xf32, #tpu.memory_space<vmem>>, vector<1x32x1xf32>
    %3 = vector.shape_cast %2 : vector<1x32x1xf32> to vector<32x1xf32>
    %4 = vector.broadcast %3 : vector<32x1xf32> to vector<32x128xf32>
    %5 = arith.mulf %1, %4 : vector<32x128xf32>
    %c0_5 = arith.constant 0 : index
    %c0_6 = arith.constant 0 : index
    %c0_7 = arith.constant 0 : index
    %6 = vector.load %arg4[%c0_5, %c0_6, %c0_7] : memref<1x32x1xf32, #tpu.memory_space<vmem>>, vector<1x32x1xf32>
    %7 = vector.shape_cast %6 : vector<1x32x1xf32> to vector<32x1xf32>
    %8 = vector.broadcast %7 : vector<32x1xf32> to vector<32x128xf32>
    %9 = arith.addf %5, %8 : vector<32x128xf32>
    %c0_8 = arith.constant 0 : index
    %c0_9 = arith.constant 0 : index
    %c0_10 = arith.constant 0 : index
    %10 = vector.load %arg5[%c0_8, %c0_9, %c0_10] : memref<1x32x128xf32, #tpu.memory_space<vmem>>, vector<1x32x128xf32>
    %11 = vector.shape_cast %10 : vector<1x32x128xf32> to vector<32x128xf32>
    %12 = vector.shape_cast %9 : vector<32x128xf32> to vector<1x32x128xf32>
    tpu.vector_store %arg5[%c0_8, %c0_9, %c0_10], %12 {strides = array<i32>} : memref<1x32x128xf32, #tpu.memory_space<vmem>>, vector<1x32x128xf32>,
    return
  }
  func.func @transform_0(%arg0: i32, %arg1: i32) -> (i32, i32, i32) {
    %c0_i32 = arith.constant 0 : i32
    %c0_i32_0 = arith.constant 0 : i32
    return %arg0, %c0_i32, %arg1 : i32, i32, i32
  }
  func.func @transform_1(%arg0: i32, %arg1: i32) -> (i32, i32, i32) {
    %c0_i32 = arith.constant 0 : i32
    %c0_i32_0 = arith.constant 0 : i32
    %c0_i32_1 = arith.constant 0 : i32
    return %arg0, %c0_i32, %c0_i32_0 : i32, i32, i32
  }
  func.func @transform_2(%arg0: i32, %arg1: i32) -> (i32, i32, i32) {
    %c0_i32 = arith.constant 0 : i32
    %c0_i32_0 = arith.constant 0 : i32
    %c0_i32_1 = arith.constant 0 : i32
    return %arg0, %c0_i32, %c0_i32_0 : i32, i32, i32
  }
  func.func @transform_3(%arg0: i32, %arg1: i32) -> (i32, i32, i32) {
    %c0_i32 = arith.constant 0 : i32
    %c0_i32_0 = arith.constant 0 : i32
    return %arg0, %c0_i32, %arg1 : i32, i32, i32
  }
}

</mosaic_0001>

<bundles_post_ra>
// kernel: speaker_splitter.3
= control target key start
LH: loop header
LB: loop body
LE: loop exit
PB: predicated region body
PF: predicated region fallthrough
CT: control target
= control target key end

     0   :  { %s644_s12 = smov 0   ;;  %s646_s13 = smov 0   ;;  %s748_s0 = inlined_call_operand.vmem [shape: f32[2,32,256], index: 0, kind: input, shape index: {}, may-alias: {0,3}]   ;;  %s749_s1 = inlined_call_operand.vmem [shape: f32[2,32,1], index: 1, kind: input, shape index: {}]   ;;  %s750_s2 = inlined_call_operand.vmem [shape: f32[2,32,1], index: 2, kind: input, shape index: {}]   ;;  %s751_s3 = inlined_call_operand.vmem [shape: f32[2,32,256], index: 3, kind: output, shape index: {}, may-alias: {0,3}]  }
   0x1   :  { %s648_s14 = smov 0   ;;  %s650_s15 = smov 0  }
   0x2   :  { %s652_s16 = smov 0   ;;  %s654_s17 = smov 0  }
   0x3   :  { %s656_s18 = smov 0  }
   0x4 LB: > { %s22_s19 = sadd.s32 1, %s613_s16  ;;  %s25_s20 = sadd.s32 1, %s617_s17  ;;  %s621_s18 = sphi %s656_s18, %s13_s18   ;;  %s617_s17 = sphi %s654_s17, %s758_s17   ;;  %s613_s16 = sphi %s652_s16, %s757_s16   ;;  %s609_s15 = sphi %s650_s15, %s756_s15   ;;  %s605_s14 = sphi %s648_s14, %s755_s14   ;;  %s601_s13 = sphi %s646_s13, %s754_s13   ;;  %s597_s12 = sphi %s644_s12, %s753_s12  }
   0x5   : > { %p23_p0 = scmp.ge.s32.totalorder %s22_s19, 2  ;;  %s486_s21 = sadd.s32 4294967295, %s621_s18  }
   0x6   : > { %p41_p1 = scmp.ne.s32.totalorder %s601_s13, %s597_s12  ;;  %p42_p2 = scmp.eq.s32.totalorder %s621_s18, 0 }
   0x7   : > { %s760_s19 = smov (%p23_p0, %s22_s19), 0  ;;  %s762_s20 = smov (!%p23_p0, %s25_s20), %s617_s17 }
   0x8   : > { %p27_p3 = scmp.ge.s32.totalorder %s762_s20, 2  ;;  %p125_p4 = scmp.eq.s32.totalorder %s486_s21, 3 }
   0x9   : > { %s30_s22 = ssub.s32 %s613_s16, %s760_s19  ;;  %p43_p5 = por %p42_p2, %p41_p1 }
   0xa   : > { %s764_s20 = smov (%p27_p3, %s762_s20), 0  ;;  %p692_p6 = por %p125_p4, %p41_p1 }
   0xb   : > { %s29_s24 = ssub.s32 %s617_s17, %s764_s20  ;;  %s34_s26 = sadd.s32 1, %s601_s13 }
   0xc   : > { %s31_s25 = sor.u32 %s30_s22, %s29_s24  ;;  %p489_p8 = scmp.ge.s32.totalorder %s621_s18, 4 }
   0xd   : > { %p32_p7 = scmp.eq.s32.totalorder %s31_s25, 0 }
   0xe   : > { %147 = sbr.rel (%p489_p8) target bundleno = 29 (0x1d), region = 16 }
   0xf   : > { %s700_s27 = scalar_select %p32_p7, %s601_s13, %s34_s26  }
  0x13   : > { %150 = sbr.rel (!%p43_p5) target bundleno = 29 (0x1d), region = 20  ;;  %s152_s28 = sand.u32 (%p43_p5), 1, %s601_s13  }
  0x14   : > { %s491_s29 = sshll.u32 (%p43_p5), %s617_s17, 3  ;;  %s490_s30 = sshll.u32 (%p43_p5), %s152_s28, 5 }
  0x15   : > { %s156_s4 = sadd.s32 (%p43_p5), %s613_s16, %s491_s29  ;;  %s154_s9 = scalar_lea.vmem (%p43_p5), [#allocation2], %s490_s30 }
  0x16   : > { %s492_s5 = sshll.u32 (%p43_p5), %s156_s4, 3 }
  0x17   : > { %s158_s8 = scalar_lea.vmem (%p43_p5), %s748_s0, %s492_s5 }
  0x18   : > { %v193_v0 = vld [vmem:[%s158_s8] sm:$0xff]  ;;  %v195_v1 = vld [vmem:[%s158_s8 + $0x10] sm:$0xff] }
  0x19   : > { %v197_v2 = vld [vmem:[%s158_s8 + $0x20] sm:$0xff]  ;;  %194 = vst [vmem:[%s154_s9] sm:$0xff] %v193_v0  ;;  %v199_v3 = vld [vmem:[%s158_s8 + $0x30] sm:$0xff] }
  0x1a   : > { %196 = vst [vmem:[%s154_s9 + $0x8] sm:$0xff] %v195_v1 }
  0x1b   : > { %198 = vst [vmem:[%s154_s9 + $0x10] sm:$0xff] %v197_v2 }
  0x1c   : > { %200 = vst [vmem:[%s154_s9 + $0x18] sm:$0xff] %v199_v3 }
  0x1d PF: > { %p493_p9 = scmp.ge.s32.totalorder %s621_s18, 1  ;;  %p221_p10 = scmp.lt.s32.totalorder %s621_s18, 5 }
  0x1f   : > { %p222_p11 = pnand %p493_p9, %p221_p10 }
  0x20   : > { %p260_p12 = scmp.lt.s32.totalorder (!%p222_p11), %s609_s15, 1  ;;  %s228_s29 = sand.u32 (!%p222_p11), 1, %s597_s12  }
  0x21   : > { %225 = sbr.rel (%p222_p11) target bundleno = 186 (0xba), region = 66  ;;  %s494_s30 = sshll.u32 (!%p222_p11), %s228_s29, 5 }
  0x22   : > { %s230_s4 = scalar_lea.vmem (!%p222_p11), [#allocation2], %s494_s30  ;;  %s259_s5 = scalar_lea.vmem (!%p222_p11), [#allocation3], %s494_s30 }
  0x26   : > { %v623_v4 = vmov 0   ;;  %s261_s10 = scalar_select %p260_p12, %s609_s15, 1  ;;  %v270_v13 = vld [vmem:[%s230_s4] sm:$0xff]  ;;  %v271_v19 = vld [vmem:[%s230_s4 + $0x8] sm:$0xff]  ;;  %v272_v25 = vld [vmem:[%s230_s4 + $0x10] sm:$0xff] }
  0x27   : > { %565 = vset.pattern.permute.xlu1 %v623_v4  ;;  %564 = vset.pattern.permute.xlu0 %v623_v4  ;;  %v273_v26 = vld [vmem:[%s230_s4 + $0x18] sm:$0xff]  ;;  %s501_s12 = sshll.u32 (%p692_p6), %s609_s15, 3 }
  0x28   : > { %566 = vset.pattern.permute.xlu2 %v623_v4  ;;  %s505_s11 = sshll.u32 %s261_s10, 5  ;;  %s342_s6 = sadd.s32 (%p692_p6), %s605_s14, %s501_s12 }
  0x29   : > { %s264_s24 = scalar_lea.vmem %s749_s1, %s505_s11  ;;  %s269_s28 = scalar_lea.vmem %s750_s2, %s505_s11 }
  0x2a   : > { %v276_v5 = vld [vmem:[%s264_s24 + $0x10] sm:$0xff]  ;;  %v274_v6 = vld [vmem:[%s264_s24] sm:$0xff]  ;;  %v277_v8 = vld [vmem:[%s264_s24 + $0x18] sm:$0xff]  ;;  %s502_s7 = sshll.u32 (%p692_p6), %s342_s6, 3 }
  0x2b   : > { %290 = vperm.xlu1 %565, %v276_v5   ;;  %280 = vperm.xlu0 %564, %v274_v6   ;;  %v302_v7 = vld [vmem:[%s269_s28] sm:$0xff]  ;;  %v275_v9 = vld [vmem:[%s264_s24 + $0x8] sm:$0xff]  ;;  %v305_v11 = vld [vmem:[%s269_s28 + $0x18] sm:$0xff]  ;;  %s344_s10 = scalar_lea.vmem (%p692_p6), %s751_s3, %s502_s7 }
  0x2c   : > { %308 = vperm.xlu2 %566, %v302_v7   ;;  %v303_v10 = vld [vmem:[%s269_s28 + $0x8] sm:$0xff]  ;;  %v304_v12 = vld [vmem:[%s269_s28 + $0x10] sm:$0xff] }
  0x33   : > { %295 = vperm.xlu1 %565, %v277_v8   ;;  %285 = vperm.xlu0 %564, %v275_v9  }
  0x34   : > { %313 = vperm.xlu2 %566, %v303_v10  }
  0x3b   : > { %323 = vperm.xlu1 %565, %v305_v11   ;;  %318 = vperm.xlu0 %564, %v304_v12  }
  0x86   : > { %v309_v14 = vpop.permute.xlu2 %308 }
  0x8e   : > { %v314_v23 = vpop.permute.xlu2 %313 }
  0x9d   : > { %v291_v15 = vpop.permute.xlu1 %290  ;;  %v281_v16 = vpop.permute.xlu0 %280 }
  0x9e   : > { %v298_v17 = vmul.f32 %v281_v16, %v270_v13  ;;  %v300_v27 = vmul.f32 %v291_v15, %v272_v25 }
  0xa0   : > { %v326_v18 = vadd.f32 %v309_v14, %v298_v17 }
  0xa2   : > { %330 = vst [vmem:[%s259_s5] sm:$0xff] %v326_v18 }
  0xa5   : > { %v296_v20 = vpop.permute.xlu1 %295  ;;  %v286_v21 = vpop.permute.xlu0 %285 }
  0xa6   : > { %v299_v22 = vmul.f32 %v286_v21, %v271_v19  ;;  %v301_v28 = vmul.f32 %v296_v20, %v273_v26 }
  0xa8   : > { %v327_v24 = vadd.f32 %v314_v23, %v299_v22 }
  0xa9   : > { %v379_v33 = vld [vmem:[%s259_s5] sm:$0xff] (%p692_p6) }
  0xaa   : > { %331 = vst [vmem:[%s259_s5 + $0x8] sm:$0xff] %v327_v24 }
  0xab   : > { %380 = vst [vmem:[%s344_s10] sm:$0xff] (%p692_p6), %v379_v33 }
  0xad   : > { %v324_v29 = vpop.permute.xlu1 %323  ;;  %v319_v30 = vpop.permute.xlu0 %318  ;;  %340 = sbr.rel (!%p692_p6) target bundleno = 186 (0xba), region = 74 }
  0xae   : > { %v329_v31 = vadd.f32 %v324_v29, %v301_v28  ;;  %v328_v32 = vadd.f32 %v319_v30, %v300_v27 }
  0xb0   : > { %333 = vst [vmem:[%s259_s5 + $0x18] sm:$0xff] %v329_v31 }
  0xb1   : > { %332 = vst [vmem:[%s259_s5 + $0x10] sm:$0xff] %v328_v32  ;;  %v381_v34 = vld [vmem:[%s259_s5 + $0x8] sm:$0xff] (%p692_p6) }
  0xb2   : > { %382 = vst [vmem:[%s344_s10 + $0x10] sm:$0xff] %v381_v34 }
  0xb7   : > { %v385_v36 = vld [vmem:[%s259_s5 + $0x18] sm:$0xff] }
  0xb8   : > { %v383_v35 = vld [vmem:[%s259_s5 + $0x10] sm:$0xff]  ;;  %386 = vst [vmem:[%s344_s10 + $0x30] sm:$0xff] %v385_v36 }
  0xb9   : > { %384 = vst [vmem:[%s344_s10 + $0x20] sm:$0xff] %v383_v35 }
  0xba PF: > { %s13_s18 = sadd.s32 1, %s621_s18   ;;  %s753_s12 = smov %s601_s13 }
  0xbb   : > { %p10_p13 = scmp.ge.s32.totalorder %s13_s18, 6   ;;  %s754_s13 = smov %s700_s27 }
  0xbc   : > { %s755_s14 = smov %s613_s16  ;;  %s756_s15 = smov %s617_s17 }
  0xbd   : > { %s757_s16 = smov %s760_s19  ;;  %s758_s17 = smov %s764_s20 }
  0xbe   :  { %12 = sbr.rel (!%p10_p13) target bundleno = 4 (0x4), region = 149 }

// kernel: speaker_splitter.2
= control target key start
LH: loop header
LB: loop body
LE: loop exit
PB: predicated region body
PF: predicated region fallthrough
CT: control target
= control target key end

     0   :  { %s1862_s0 = inlined_call_operand.vmem [shape: f32[2,16,256], index: 0, kind: input, shape index: {}]   ;;  %s1863_s1 = inlined_call_operand.vmem [shape: bf16[64,16], index: 1, kind: input, shape index: {}]   ;;  %s1864_s2 = inlined_call_operand.vmem [shape: bf16[64,16], index: 2, kind: input, shape index: {}]   ;;  %s1865_s3 = inlined_call_operand.vmem [shape: f32[64,1], index: 3, kind: input, shape index: {}]   ;;  %s1866_s4 = inlined_call_operand.vmem [shape: f32[64,1], index: 4, kind: input, shape index: {}]   ;;  %s1867_s5 = inlined_call_operand.vmem [shape: bf16[32,64], index: 5, kind: input, shape index: {}]   ;;  %s1868_s6 = inlined_call_operand.vmem [shape: f32[32,1], index: 6, kind: input, shape index: {}]   ;;  %s1869_s7 = inlined_call_operand.vmem [shape: f32[2,32,256], index: 7, kind: output, shape index: {0}]   ;;  %s1870_s8 = inlined_call_operand.vmem [shape: f32[2,2,128], index: 8, kind: output, shape index: {1}]   ;;  %s1871_s9 = inlined_call_operand.vmem [shape: f32[2,2,128], index: 9, kind: output, shape index: {2}]  }
   0x1   :  { %1874 = sst [smem:[#allocation6_spill]] %s1862_s0 }
   0x2   :  { %s1402_s30 = smov 0   ;;  %s1404_s10 = smov 0  }
   0x3   :  { %s1406_s11 = smov 0   ;;  %s1408_s12 = smov 0  }
   0x4   :  { %s1410_s13 = smov 0   ;;  %s1412_s14 = smov 0  }
   0x5   :  { %s1414_s15 = smov 0  }
   0x6 LB: > { %s29_s16 = sadd.s32 1, %s1340_s13  ;;  %s32_s17 = sadd.s32 1, %s1344_s14  ;;  %s1348_s15 = sphi %s1414_s15, %s20_s15   ;;  %s1344_s14 = sphi %s1412_s14, %s1912_s14   ;;  %s1340_s13 = sphi %s1410_s13, %s1911_s13   ;;  %s1336_s12 = sphi %s1408_s12, %s1910_s12   ;;  %s1332_s11 = sphi %s1406_s11, %s1909_s11   ;;  %s1328_s10 = sphi %s1404_s10, %s1908_s10   ;;  %s1324_s30 = sphi %s1402_s30, %s1907_s30  }
   0x7   : > { %p30_p0 = scmp.ge.s32.totalorder %s29_s16, 2  ;;  %s1113_s18 = sadd.s32 4294967295, %s1348_s15  }
   0x8   : > { %p48_p1 = scmp.ne.s32.totalorder %s1328_s10, %s1324_s30  ;;  %p49_p2 = scmp.eq.s32.totalorder %s1348_s15, 0 }
   0x9   : > { %s1914_s16 = smov (%p30_p0, %s29_s16), 0  ;;  %s1916_s17 = smov (!%p30_p0, %s32_s17), %s1344_s14 }
   0xa   : > { %1875 = sst [smem:[#allocation4_spill]] %s1914_s16  ;;  %p34_p3 = scmp.ge.s32.totalorder %s1916_s17, 2 }
   0xb   : > { %p206_p4 = scmp.eq.s32.totalorder %s1113_s18, 3  ;;  %s37_s19 = ssub.s32 %s1340_s13, %s1914_s16 }
   0xc   : > { %p50_p5 = por %p49_p2, %p48_p1  ;;  %s1918_s17 = smov (%p34_p3, %s1916_s17), 0 }
   0xd   : > { %1876 = sst [smem:[#allocation5_spill]] %s1918_s17  ;;  %p1450_p6 = por %p206_p4, %p48_p1 }
   0xe   : > { %s36_s21 = ssub.s32 %s1344_s14, %s1918_s17  ;;  %s41_s23 = sadd.s32 1, %s1328_s10 }
   0xf   : > { %s38_s22 = sor.u32 %s37_s19, %s36_s21  ;;  %p1116_p8 = scmp.ge.s32.totalorder %s1348_s15, 4 }
  0x10   : > { %p39_p7 = scmp.eq.s32.totalorder %s38_s22, 0 }
  0x11   : > { %298 = sbr.rel (%p1116_p8) target bundleno = 34 (0x22), region = 40 }
  0x12   : > { %s1458_s24 = scalar_select %p39_p7, %s1328_s10, %s41_s23  }
  0x16   : > { %301 = sbr.rel (!%p50_p5) target bundleno = 34 (0x22), region = 44  ;;  %s303_s25 = sand.u32 (%p50_p5), 1, %s1328_s10  }
  0x17   : > { %s1118_s26 = sshll.u32 (%p50_p5), %s1344_s14, 2  ;;  %s1117_s27 = sshll.u32 (%p50_p5), %s303_s25, 4 }
  0x18   : > { %s307_s28 = sadd.s32 (%p50_p5), %s1340_s13, %s1118_s26  ;;  %s1878_s0 = sld [smem:[#allocation6_spill]] (%p50_p5) }
  0x19   : > { %s1119_s29 = sshll.u32 (%p50_p5), %s307_s28, 3  ;;  %s305_s21 = scalar_lea.vmem (%p50_p5), [#allocation2], %s1117_s27 }
  0x1e   : > { %s309_s19 = scalar_lea.vmem %s1878_s0, %s1119_s29 }
  0x1f   : > { %v340_v0 = vld [vmem:[%s309_s19] sm:$0xff]  ;;  %v342_v1 = vld [vmem:[%s309_s19 + $0x10] sm:$0xff] }
  0x20   : > { %341 = vst [vmem:[%s305_s21] sm:$0xff] %v340_v0 }
  0x21   : > { %343 = vst [vmem:[%s305_s21 + $0x8] sm:$0xff] %v342_v1 }
  0x22 PF: > { %p1120_p9 = scmp.ge.s32.totalorder %s1348_s15, 1  ;;  %p348_p10 = scmp.lt.s32.totalorder %s1348_s15, 5 }
  0x24   : > { %p349_p11 = pnand %p1120_p9, %p348_p10 }
  0x25   : > { %s355_s22 = sand.u32 (!%p349_p11), 1, %s1324_s30   ;;  %p397_p12 = scmp.lt.s32.totalorder (!%p349_p11), %s1336_s12, 1 }
  0x26   : > { %352 = sbr.rel (%p349_p11) target bundleno = 456 (0x1c8), region = 82  ;;  %s1121_s16 = sshll.u32 (!%p349_p11), %s355_s22, 4 }
  0x27   : > { %s1122_s23 = sshll.u32 (!%p349_p11), %s355_s22, 5  ;;  %s357_s0 = scalar_lea.vmem (!%p349_p11), [#allocation2], %s1121_s16 }
  0x28   : > { %s1482_s17 = scalar_lea.vmem (!%p349_p11), [#allocation3], %s1122_s23  ;;  %p1125_p13 = scmp.ne.s32.totalorder (!%p349_p11), %s1332_s11, 0 }
  0x2b   : > { %s398_s25 = scalar_select %p397_p12, %s1336_s12, 1 }
  0x2c   : > { %409 = sbr.rel (%p1125_p13) target bundleno = 52 (0x34), region = 90 }
  0x2d   : > { %s1123_s26 = sshll.u32 %s398_s25, 1 }
  0x2e   : > { %s1475_s29 = scalar_lea.vmem %s1870_s8, %s1123_s26  ;;  %s1480_s21 = scalar_lea.vmem %s1871_s9, %s1123_s26 }
  0x31   : > { %v1350_v2 = vmov 0.0  }
  0x32   : > { %410 = vst [vmem:[%s1475_s29] sm:$0x3] %v1350_v2 }
  0x33   : > { %411 = vst [vmem:[%s1480_s21] sm:$0x3] %v1350_v2 }
  0x34 PF: > { %v547_v3 = vld [vmem:[%s1866_s4 + $0x30] sm:$0xff]  ;;  %v413_v5 = vld [vmem:[%s357_s0 + $0x8] sm:$0xff]  ;;  %v1351_v6 = vmov 0   ;;  %v545_v8 = vld [vmem:[%s1866_s4 + $0x20] sm:$0xff]  ;;  %vm491_vm0 = vcmask 130048   ;;  %s1185_s26 = sshll.u32 (%p1450_p6), %s1336_s12, 3 }
  0x35   : > { %v412_v4 = vld [vmem:[%s357_s0] sm:$0xff]  ;;  %1259 = vset.pattern.permute.xlu0 %v1351_v6  ;;  %1260 = vset.pattern.permute.xlu1 %v1351_v6  ;;  %v1190_v10 = vld [vmem:[%s1863_s1 + $0x8] sm:$0xff]  ;;  %v548_v13 = vld [vmem:[%s1866_s4 + $0x38] sm:$0xff]  ;;  %s939_s27 = sadd.s32 (%p1450_p6), %s1332_s11, %s1185_s26 }
  0x36   : > { %v414_v7 = vpack.c.bf16 %v413_v5, %v412_v4  ;;  %581 = vperm.xlu0 %1259, %v547_v3   ;;  %571 = vperm.xlu1 %1260, %v545_v8   ;;  %v1189_v9 = vld [vmem:[%s1863_s1] sm:$0xff]  ;;  %v1194_v11 = vld [vmem:[%s1864_s2 + $0x8] sm:$0xff]  ;;  %v543_v12 = vld [vmem:[%s1866_s4 + $0x10] sm:$0xff]  ;;  %s1186_s28 = sshll.u32 (%p1450_p6), %s939_s27, 3 }
  0x37   : > { %1261 = vset.pattern.permute.xlu2 %v1351_v6  ;;  %v546_v14 = vld [vmem:[%s1866_s4 + $0x28] sm:$0xff]  ;;  %v544_v15 = vld [vmem:[%s1866_s4 + $0x18] sm:$0xff]  ;;  %v541_v16 = vld [vmem:[%s1866_s4] sm:$0xff] }
  0x38   : > { %511 = vmatpush.bf16.msra.mxu0 %v414_v7  ;;  %1199 = vmatpush.bf16.msra.mxu3 %v414_v7  ;;  %v542_v17 = vld [vmem:[%s1866_s4 + $0x8] sm:$0xff]  ;;  %v1191_v18 = vld [vmem:[%s1863_s1 + $0x10] sm:$0xff]  ;;  %v1193_v19 = vld [vmem:[%s1864_s2] sm:$0xff] }
  0x39   : > { %1200 = vmatpush.bf16.msra.mxu1 %v414_v7  ;;  %561 = vperm.xlu2 %1261, %v543_v12   ;;  %v1195_v20 = vld [vmem:[%s1864_s2 + $0x10] sm:$0xff]  ;;  %v430_v22 = vld [vmem:[%s1865_s3 + $0x38] sm:$0xff]  ;;  %v427_v23 = vld [vmem:[%s1865_s3 + $0x20] sm:$0xff] }
  0x3a   : > { %v429_v21 = vld [vmem:[%s1865_s3 + $0x30] sm:$0xff]  ;;  %v428_v24 = vld [vmem:[%s1865_s3 + $0x28] sm:$0xff]  ;;  %v426_v26 = vld [vmem:[%s1865_s3 + $0x18] sm:$0xff] }
  0x3b   : > { %1142 = vmatmul.msk.bf16.vlgmr.msra.gmra.mxu0 %vm491_vm0, %v1189_v9  ;;  %1143 = vmatmul.msk.bf16.vlgmr.msra.gmra.mxu3 %vm491_vm0, %v1190_v10  ;;  %v425_v25 = vld [vmem:[%s1865_s3 + $0x10] sm:$0xff]  ;;  %v1192_v27 = vld [vmem:[%s1863_s1 + $0x18] sm:$0xff]  ;;  %v423_v29 = vld [vmem:[%s1865_s3] sm:$0xff] }
  0x3c   : > { %628 = vmatpush.bf16.msrb.mxu0 %v414_v7  ;;  %1163 = vmatmul.msk.bf16.vlgmr.msra.gmra.mxu1 %vm491_vm0, %v1194_v11  ;;  %v1196_v28 = vld [vmem:[%s1864_s2 + $0x18] sm:$0xff]  ;;  %v424_v30 = vld [vmem:[%s1865_s3 + $0x8] sm:$0xff]  ;;  %v818_v31 = vld [vmem:[%s1868_s6] sm:$0xff] }
  0x3d   : > { %v819_v32 = vld [vmem:[%s1868_s6 + $0x8] sm:$0xff]  ;;  %v820_v33 = vld [vmem:[%s1868_s6 + $0x10] sm:$0xff]  ;;  %v821_v34 = vld [vmem:[%s1868_s6 + $0x18] sm:$0xff] }
  0x3e   : > { %586 = vperm.xlu0 %1259, %v548_v13   ;;  %576 = vperm.xlu1 %1260, %v546_v14  }
  0x41   : > { %566 = vperm.xlu2 %1261, %v544_v15  }
  0x46   : > { %551 = vperm.xlu0 %1259, %v541_v16   ;;  %556 = vperm.xlu1 %1260, %v542_v17  }
  0x49   : > { %463 = vperm.xlu2 %1261, %v429_v21  }
  0x4b   : > { %1144 = vmatmul.msk.bf16.gmra.mxu3 %vm491_vm0, %v1191_v18  ;;  %1162 = vmatmul.msk.bf16.vlgmr.msrb.gmra.mxu0 %vm491_vm0, %v1193_v19 }
  0x4c   : > { %1164 = vmatmul.msk.bf16.gmra.mxu1 %vm491_vm0, %v1195_v20 }
  0x4e   : > { %468 = vperm.xlu0 %1259, %v430_v22   ;;  %453 = vperm.xlu1 %1260, %v427_v23  }
  0x51   : > { %458 = vperm.xlu2 %1261, %v428_v24  }
  0x56   : > { %443 = vperm.xlu0 %1259, %v425_v25   ;;  %448 = vperm.xlu1 %1260, %v426_v26  }
  0x59   : > { %433 = vperm.xlu2 %1261, %v423_v29  }
  0x5b   : > { %1145 = vmatmul.msk.bf16.gmra.mxu3 %vm491_vm0, %v1192_v27 }
  0x5c   : > { %1165 = vmatmul.msk.bf16.gmra.mxu1 %vm491_vm0, %v1196_v28 }
  0x5e   : > { %438 = vperm.xlu0 %1259, %v424_v30   ;;  %824 = vperm.xlu1 %1260, %v818_v31  }
  0x61   : > { %829 = vperm.xlu2 %1261, %v819_v32  }
  0x66   : > { %834 = vperm.xlu0 %1259, %v820_v33   ;;  %839 = vperm.xlu1 %1260, %v821_v34  }
  0x93   : > { %v562_v38 = vpop.permute.xlu2 %561 }
  0x9b   : > { %v567_v46 = vpop.permute.xlu2 %566 }
  0xa3   : > { %v1614_v27 = vpop.permute.xlu2 %463 }
  0xa8   : > { %v582_v37 = vpop.permute.xlu0 %581  ;;  %v572_v40 = vpop.permute.xlu1 %571 }
  0xb0   : > { %v587_v42 = vpop.permute.xlu0 %586  ;;  %v577_v48 = vpop.permute.xlu1 %576 }
  0xb8   : > { %v1579_v35 = vpop.f32.mrf.mxu0  ;;  %v552_v55 = vpop.permute.xlu0 %551 }
  0xb9   : > { %v635_v36 = vpop.f32.mrf.mxu1  ;;  %v557_v61 = vpop.permute.xlu1 %556 }
  0xba   : > { %v636_v43 = vadd.f32 %v635_v36, %v562_v38 }
  0xbc   : > { %v1168_v50 = vmul.f32 -1.442695, %v636_v43 }
  0xbe   : > { %v1583_v47 = vpop.f32.mrf.mxu3  ;;  %1262 = vpow2.f32 %v1168_v50 }
  0xc0   : > { %v1581_v39 = vpop.f32.mrf.mxu0 }
  0xc1   : > { %v637_v41 = vpop.f32.mrf.mxu1 }
  0xc2   : > { %v638_v49 = vadd.f32 %v637_v41, %v567_v46  ;;  %v454_v46 = vpop.permute.xlu1 %453 }
  0xc4   : > { %v1169_v51 = vmul.f32 -1.442695, %v638_v49  ;;  %v1263_v62 = vpop.eup %1262 }
  0xc5   : > { %v1587_v2 = vadd.f32 1.0, %v1263_v62 }
  0xc6   : > { %1264 = vpow2.f32 %v1169_v51  ;;  %v1585_v58 = vpop.f32.mrf.mxu3 }
  0xc8   : > { %v630_v44 = vpop.f32.mrf.mxu0 }
  0xc9   : > { %v640_v45 = vpop.f32.mrf.mxu1  ;;  %v631_v59 = vadd.f32 %v630_v44, %v552_v55 }
  0xca   : > { %v641_v52 = vadd.f32 %v640_v45, %v572_v40 }
  0xcb   : > { %v1166_v0 = vmul.f32 -1.442695, %v631_v59  ;;  %v459_v59 = vpop.permute.xlu2 %458 }
  0xcc   : > { %v1170_v56 = vmul.f32 -1.442695, %v641_v52  ;;  %v1265_v1 = vpop.eup %1264 }
  0xcd   : > { %v1589_v6 = vadd.f32 1.0, %v1265_v1 }
  0xce   : > { %1266 = vpow2.f32 %v1170_v56  ;;  %v523_v9 = vpop.f32.mrf.mxu3 }
  0xcf   : > { %v736_v49 = vand.u32 2147483647, %v1589_v6  ;;  %v1647_v55 = vadd.f32 %v523_v9, %v454_v46  ;;  %vm732_vm4 = vweird.f32 %v1589_v6 }
  0xd0   : > { %v632_v57 = vpop.f32.mrf.mxu0 }
  0xd1   : > { %v642_v53 = vpop.f32.mrf.mxu1  ;;  %v633_v63 = vadd.f32 %v632_v57, %v557_v61  ;;  %v1651_v57 = vpop.permute.xlu0 %468  ;;  %vm1699_vm0 = vcmp.eq.f32.partialorder %v736_v49, 8.507059e+37 }
  0xd2   : > { %v643_v54 = vadd.f32 %v642_v53, %v577_v48  ;;  %v723_v48 = vand.u32 2147483648, %v1587_v2 }
  0xd3   : > { %v1167_v4 = vmul.f32 -1.442695, %v633_v63 }
  0xd4   : > { %v1171_v60 = vmul.f32 -1.442695, %v643_v54  ;;  %v1267_v7 = vpop.eup %1266  ;;  %v738_v54 = vand.u32 2147483648, %v1589_v6 }
  0xd5   : > { %v1595_v12 = vadd.f32 1.0, %v1267_v7 }
  0xd6   : > { %1268 = vpow2.f32 %v1171_v60  ;;  %v525_v23 = vpop.f32.mrf.mxu3 }
  0xd7   : > { %1270 = vpow2.f32 %v1166_v0  ;;  %v753_v40 = vand.u32 2147483648, %v1595_v12  ;;  %vm747_vm2 = vweird.f32 %v1595_v12  ;;  %v751_v60 = vand.u32 2147483647, %v1595_v12 }
  0xd8   : > { %1272 = vrcp.f32 %v1587_v2  ;;  %v1663_v0 = vadd.f32 %v525_v23, %v459_v59 }
  0xd9   : > { %v645_v3 = vpop.f32.mrf.mxu1  ;;  %1274 = vpow2.f32 %v1167_v4  ;;  %v1656_v61 = vor.u32 1.1754944e-38, %v753_v40  ;;  %vm1680_vm12 = vcmp.eq.f32.partialorder %v751_v60, 8.507059e+37 }
  0xda   : > { %v646_v5 = vadd.f32 %v645_v3, %v582_v37  ;;  %1276 = vrcp.f32 %v1589_v6 }
  0xdc   : > { %v1269_v8 = vpop.eup %1268  ;;  %v1172_v10 = vmul.f32 -1.442695, %v646_v5 }
  0xdd   : > { %v1593_v11 = vadd.f32 1.0, %v1269_v8  ;;  %v1271_v14 = vpop.eup %1270 }
  0xde   : > { %v1597_v15 = vpop.eup %1272  ;;  %1278 = vpow2.f32 %v1172_v10  ;;  %v1600_v18 = vadd.f32 1.0, %v1271_v14  ;;  %v528_v52 = vpop.f32.mrf.mxu3 }
  0xdf   : > { %v1275_v17 = vpop.eup %1274  ;;  %1280 = vrcp.f32 %v1593_v11  ;;  %v713_v21 = vmul.f32 %v1597_v15, %v1587_v2  ;;  %vm718_vm3 = vweird.f32 %v1597_v15  ;;  %vm762_vm6 = vweird.f32 %v1593_v11 }
  0xe0   : > { %1282 = vrcp.f32 %v1595_v12  ;;  %v1603_v20 = vpop.eup %1276  ;;  %v1607_v22 = vadd.f32 1.0, %v1275_v17  ;;  %v766_v8 = vand.u32 2147483647, %v1593_v11 }
  0xe1   : > { %v647_v13 = vpop.f32.mrf.mxu1  ;;  %v728_v25 = vmul.f32 %v1603_v20, %v1589_v6  ;;  %v714_v30 = vsub.f32 1.0, %v713_v21  ;;  %vm733_vm1 = vweird.f32 %v1603_v20 }
  0xe2   : > { %v648_v16 = vadd.f32 %v647_v13, %v587_v42  ;;  %v721_v42 = vand.u32 2147483647, %v1587_v2 }
  0xe3   : > { %v729_v32 = vsub.f32 1.0, %v728_v25  ;;  %v715_v38 = vmul.f32 %v1597_v15, %v714_v30  ;;  %v768_v30 = vand.u32 2147483648, %v1593_v11 }
  0xe4   : > { %v1173_v19 = vmul.f32 -1.442695, %v648_v16  ;;  %v1279_v24 = vpop.eup %1278  ;;  %v449_v16 = vpop.permute.xlu1 %448 }
  0xe5   : > { %v1612_v26 = vpop.eup %1280  ;;  %v1616_v28 = vadd.f32 1.0, %v1279_v24  ;;  %v730_v43 = vmul.f32 %v1603_v20, %v729_v32  ;;  %v1644_v53 = vadd.f32 %v1597_v15, %v715_v38 }
  0xe6   : > { %1284 = vpow2.f32 %v1173_v19  ;;  %v1618_v29 = vpop.eup %1282  ;;  %v758_v33 = vmul.f32 %v1612_v26, %v1593_v11  ;;  %vm763_vm10 = vweird.f32 %v1612_v26  ;;  %v530_v46 = vpop.f32.mrf.mxu3 }
  0xe7   : > { %1286 = vrcp.f32 %v1600_v18  ;;  %v743_v34 = vmul.f32 %v1618_v29, %v1595_v12  ;;  %v1661_v63 = vadd.f32 %v1603_v20, %v730_v43  ;;  %vm748_vm5 = vweird.f32 %v1618_v29 }
  0xe8   : > { %1288 = vrcp.f32 %v1607_v22  ;;  %v759_v44 = vsub.f32 1.0, %v758_v33  ;;  %vm777_vm11 = vweird.f32 %v1616_v28  ;;  %v783_v14 = vand.u32 2147483648, %v1616_v28 }
  0xe9   : > { %1290 = vrcp.f32 %v1616_v28  ;;  %v744_v50 = vsub.f32 1.0, %v743_v34  ;;  %v781_v21 = vand.u32 2147483647, %v1616_v28 }
  0xea   : > { %v760_v1 = vmul.f32 %v1612_v26, %v759_v44  ;;  %v784_v49 = vor.u32 1.1754944e-38, %v783_v14 }
  0xeb   : > { %v745_v5 = vmul.f32 %v1618_v29, %v744_v50 }
  0xec   : > { %v1285_v31 = vpop.eup %1284  ;;  %v761_v17 = vadd.f32 %v1612_v26, %v760_v1  ;;  %v708_v1 = vand.u32 2147483648, %v1607_v22 }
  0xed   : > { %v1626_v36 = vadd.f32 1.0, %v1285_v31  ;;  %v1628_v37 = vpop.eup %1286  ;;  %v746_v24 = vadd.f32 %v1618_v29, %v745_v5 }
  0xee   : > { %v1633_v41 = vpop.eup %1288  ;;  %v683_v51 = vmul.f32 %v1628_v37, %v1600_v18 }
  0xef   : > { %1292 = vrcp.f32 %v1626_v36  ;;  %v1637_v45 = vpop.eup %1290  ;;  %v698_v62 = vmul.f32 %v1633_v41, %v1607_v22  ;;  %v798_v32 = vand.u32 2147483648, %v1626_v36  ;;  %v796_v38 = vand.u32 2147483647, %v1626_v36 }
  0xf0   : > { %v773_v56 = vmul.f32 %v1637_v45, %v1616_v28  ;;  %v684_v7 = vsub.f32 1.0, %v683_v51  ;;  %vm778_vm8 = vweird.f32 %v1637_v45  ;;  %vm792_vm14 = vweird.f32 %v1626_v36 }
  0xf1   : > { %v699_v13 = vsub.f32 1.0, %v698_v62  ;;  %vm1694_vm15 = vmor %vm777_vm11, %vm778_vm8  ;;  %vm1716_vm11 = vcmp.eq.f32.partialorder %v766_v8, 8.507059e+37  ;;  %vm703_vm7 = vweird.f32 %v1633_v41  ;;  %v799_v12 = vor.u32 1.1754944e-38, %v798_v32 }
  0xf2   : > { %v774_v3 = vsub.f32 1.0, %v773_v56  ;;  %v685_v25 = vmul.f32 %v1628_v37, %v684_v7  ;;  %vm1712_vm8 = vmor %vm762_vm6, %vm763_vm10  ;;  %vm782_vm10 = vcmp.eq.f32.partialorder %v781_v21, 8.507059e+37  ;;  %v739_v8 = vor.u32 1.1754944e-38, %v738_v54 }
  0xf3   : > { %v700_v40 = vmul.f32 %v1633_v41, %v699_v13  ;;  %vm1731_vm6 = vmor %vm747_vm2, %vm748_vm5  ;;  %vm797_vm5 = vcmp.eq.f32.partialorder %v796_v38, 8.507059e+37  ;;  %v693_v13 = vand.u32 2147483648, %v1600_v18 }
  0xf4   : > { %v775_v9 = vmul.f32 %v1637_v45, %v774_v3  ;;  %vm1745_vm2 = vmor %vm732_vm4, %vm733_vm1  ;;  %vm1895_vm1 = vweird.f32 %v1587_v2  ;;  %v686_v14 = vadd.f32 %v1628_v37, %v685_v25 }
  0xf5   : > { %v1293_v4 = vpop.eup %1292  ;;  %v735_v62 = vsel %vm1745_vm2, %v1603_v20, %v1661_v63  ;;  %vm1764_vm4 = vmor %vm1895_vm1, %vm718_vm3  ;;  %vm1898_vm3 = vweird.f32 %v1607_v22  ;;  %v694_v21 = vor.u32 1.1754944e-38, %v693_v13 }
  0xf6   : > { %v788_v10 = vmul.f32 %v1293_v4, %v1626_v36  ;;  %v776_v19 = vadd.f32 %v1637_v45, %v775_v9  ;;  %vm793_vm13 = vweird.f32 %v1293_v4  ;;  %v531_v36 = vadd.f32 %v530_v46, %v1651_v57 }
  0xf7   : > { %vm794_vm9 = vmor %vm792_vm14, %vm793_vm13  ;;  %v701_v57 = vadd.f32 %v1633_v41, %v700_v40  ;;  %v720_v63 = vsel %vm1764_vm4, %v1597_v15, %v1644_v53  ;;  %v691_v15 = vand.u32 2147483647, %v1600_v18  ;;  %v825_v40 = vpop.permute.xlu1 %824 }
  0xf8   : > { %v789_v23 = vsub.f32 1.0, %v788_v10  ;;  %v780_v28 = vsel %vm1694_vm15, %v1637_v45, %v776_v19  ;;  %v529_v45 = vadd.f32 %v528_v52, %v1614_v27  ;;  %vm1723_vm15 = vcmp.eq.f32.partialorder %v721_v42, 8.507059e+37  ;;  %v444_v42 = vpop.permute.xlu0 %443  ;;  %v914_v19 = vld [vmem:[%s1475_s29] sm:$0x3] }
  0xf9   : > { %v765_v27 = vsel %vm1712_vm8, %v1612_v26, %v761_v17  ;;  %v769_v52 = vor.u32 1.1754944e-38, %v768_v30  ;;  %v785_v56 = vsel %vm782_vm10, %v784_v49, %v780_v28  ;;  %v750_v26 = vsel %vm1731_vm6, %v1618_v29, %v746_v24 }
  0xfa   : > { %v790_v34 = vmul.f32 %v1293_v4, %v789_v23  ;;  %v808_v7 = vmul.f32 %v785_v56, %v529_v45  ;;  %v755_v9 = vsel %vm1680_vm12, %v1656_v61, %v750_v26  ;;  %v519_v54 = vadd.f32 %v1583_v47, %v444_v42 }
  0xfb   : > { %v770_v3 = vsel %vm1716_vm11, %v769_v52, %v765_v27  ;;  %v724_v61 = vor.u32 1.1754944e-38, %v723_v48  ;;  %v709_v17 = vor.u32 1.1754944e-38, %v708_v1  ;;  %vm1902_vm12 = vweird.f32 %v1600_v18 }
  0xfc   : > { %v791_v51 = vadd.f32 %v1293_v4, %v790_v34  ;;  %v807_v6 = vmul.f32 %v770_v3, %v1663_v0  ;;  %v521_v0 = vadd.f32 %v1585_v58, %v449_v16  ;;  %v806_v47 = vmul.f32 %v755_v9, %v1647_v55  ;;  %v434_v55 = vpop.permute.xlu2 %433 }
  0xfd   : > { %v725_v48 = vsel %vm1723_vm15, %v724_v61, %v720_v63  ;;  %v514_v33 = vadd.f32 %v1579_v35, %v434_v55  ;;  %vm852_vm8 = vcmask 523264   ;;  %vm915_vm11 = vcmask 1040384  }
  0xfe   : > { %v795_v60 = vsel %vm794_vm9, %v1293_v4, %v791_v51  ;;  %v706_v4 = vand.u32 2147483647, %v1607_v22  ;;  %vm1783_vm9 = vmor %vm1898_vm3, %vm703_vm7  ;;  %v740_v22 = vsel %vm1699_vm0, %v739_v8, %v735_v62  ;;  %vm1901_vm7 = vweird.f32 %v1628_v37 }
  0xff   : > { %v800_v5 = vsel %vm797_vm5, %v799_v12, %v795_v60  ;;  %vm1800_vm13 = vmor %vm1902_vm12, %vm1901_vm7  ;;  %v705_v2 = vsel %vm1783_vm9, %v1633_v41, %v701_v57  ;;  %v805_v23 = vmul.f32 %v740_v22, %v521_v0  ;;  %vm692_vm0 = vcmp.eq.f32.partialorder %v691_v15, 8.507059e+37  ;;  %v840_v26 = vpop.permute.xlu1 %839 }
 0x100   : > { %v809_v20 = vmul.f32 %v800_v5, %v531_v36  ;;  %vm707_vm14 = vcmp.eq.f32.partialorder %v706_v4, 8.507059e+37  ;;  %v690_v18 = vsel %vm1800_vm13, %v1628_v37, %v686_v14  ;;  %v816_v24 = vpack.c.bf16 %v807_v6, %v806_v47  ;;  %v439_v58 = vpop.permute.xlu0 %438  ;;  %v1197_v37 = vld [vmem:[%s1867_s5] sm:$0xff] }
 0x101   : > { %v710_v25 = vsel %vm707_vm14, %v709_v17, %v705_v2  ;;  %v804_v30 = vmul.f32 %v725_v48, %v519_v54  ;;  %v516_v31 = vadd.f32 %v1581_v39, %v439_v58  ;;  %v695_v41 = vsel %vm692_vm0, %v694_v21, %v690_v18  ;;  %v1198_v39 = vld [vmem:[%s1867_s5 + $0x8] sm:$0xff]  ;;  %v919_v48 = vld [vmem:[%s1480_s21] sm:$0x3] }
 0x102   : > { %v817_v53 = vpack.c.bf16 %v809_v20, %v808_v7  ;;  %v802_v34 = vmul.f32 %v695_v41, %v514_v33 }
 0x103   : > { %v803_v32 = vmul.f32 %v710_v25, %v516_v31  ;;  %v815_v28 = vpack.c.bf16 %v805_v23, %v804_v30 }
 0x104   : > { %863 = vmatpush.bf16.msra.mxu2 %v817_v53  ;;  %v830_v44 = vpop.permute.xlu2 %829 }
 0x105   : > { %v814_v38 = vpack.c.bf16 %v803_v32, %v802_v34 }
 0x108   : > { %864 = vmatpush.bf16.msra.mxu2 %v816_v24  ;;  %v835_v27 = vpop.permute.xlu0 %834 }
 0x10c   : > { %865 = vmatpush.bf16.msra.mxu2 %v815_v28 }
 0x110   : > { %866 = vmatpush.bf16.msra.mxu2 %v814_v38 }
 0x113   : > { %1182 = vmatmul.msk.bf16.vlgmr.msra.gmra.mxu2 %vm852_vm8, %v1197_v37 }
 0x123   : > { %1183 = vmatmul.msk.bf16.gmra.mxu2 %vm852_vm8, %v1198_v39 }
 0x196   : > { %v868_v35 = vpop.f32.mrf.mxu2 }
 0x197   : > { %v869_v43 = vadd.f32 %v868_v35, %v825_v40 }
 0x199   : > { %878 = vst [vmem:[%s1482_s17] sm:$0xff] %v869_v43  ;;  %v889_v50 = vmul.f32 %v869_v43, %v869_v43 }
 0x19e   : > { %v870_v45 = vpop.f32.mrf.mxu2 }
 0x19f   : > { %v871_v46 = vadd.f32 %v870_v45, %v830_v44 }
 0x1a0   : > { %v976_v24 = vld [vmem:[%s1482_s17] sm:$0xff] (%p1450_p6) }
 0x1a1   : > { %879 = vst [vmem:[%s1482_s17 + $0x8] sm:$0xff] %v871_v46  ;;  %v890_v49 = vmul.f32 %v871_v46, %v871_v46  ;;  %v882_v11 = vadd.f32 %v871_v46, %v869_v43 }
 0x1a3   : > { %v891_v42 = vadd.f32 %v890_v49, %v889_v50  ;;  %v883_v56 = vrot.slane %v882_v11, 4 }
 0x1a5   : > { %v892_v12 = vrot.slane %v891_v42, 4  ;;  %v884_v59 = vadd.f32 %v883_v56, %v882_v11 }
 0x1a6   : > { %v873_v51 = vpop.f32.mrf.mxu2 }
 0x1a7   : > { %v874_v52 = vadd.f32 %v873_v51, %v835_v27  ;;  %v893_v60 = vadd.f32 %v892_v12, %v891_v42  ;;  %v885_v1 = vrot.slane %v884_v59, 2 }
 0x1a8   : > { %v978_v58 = vld [vmem:[%s1482_s17 + $0x8] sm:$0xff] (%p1450_p6) }
 0x1a9   : > { %880 = vst [vmem:[%s1482_s17 + $0x10] sm:$0xff] %v874_v52  ;;  %v905_v3 = vmul.f32 %v874_v52, %v874_v52  ;;  %v894_v57 = vrot.slane %v893_v60, 2  ;;  %v886_v20 = vadd.f32 %v885_v1, %v884_v59 }
 0x1ab   : > { %v895_v9 = vadd.f32 %v894_v57, %v893_v60  ;;  %v887_v14 = vrot.slane %v886_v20, 1 }
 0x1ad   : > { %v896_v53 = vrot.slane %v895_v9, 1  ;;  %v888_v16 = vadd.f32 %v887_v14, %v886_v20 }
 0x1ae   : > { %v875_v36 = vpop.f32.mrf.mxu2 }
 0x1af   : > { %v876_v62 = vadd.f32 %v875_v36, %v840_v26  ;;  %v897_v0 = vadd.f32 %v896_v53, %v895_v9 }
 0x1b0   : > { %v980_v25 = vld [vmem:[%s1482_s17 + $0x10] sm:$0xff] (%p1450_p6) }
 0x1b1   : > { %881 = vst [vmem:[%s1482_s17 + $0x18] sm:$0xff] %v876_v62  ;;  %v898_v5 = vadd.f32 %v876_v62, %v874_v52  ;;  %v906_v29 = vmul.f32 %v876_v62, %v876_v62 }
 0x1b3   : > { %v899_v4 = vrot.slane %v898_v5, 4  ;;  %v907_v7 = vadd.f32 %v906_v29, %v905_v3 }
 0x1b5   : > { %v900_v63 = vadd.f32 %v899_v4, %v898_v5  ;;  %v908_v8 = vrot.slane %v907_v7, 4 }
 0x1b7   : > { %v901_v10 = vrot.slane %v900_v63, 2  ;;  %v909_v13 = vadd.f32 %v908_v8, %v907_v7 }
 0x1b8   : > { %v982_v55 = vld [vmem:[%s1482_s17 + $0x18] sm:$0xff] (%p1450_p6) }
 0x1b9   : > { %v902_v15 = vadd.f32 %v901_v10, %v900_v63  ;;  %v910_v6 = vrot.slane %v909_v13, 2 }
 0x1bb   : > { %v903_v54 = vrot.slane %v902_v15, 1  ;;  %v911_v61 = vadd.f32 %v910_v6, %v909_v13 }
 0x1bd   : > { %v904_v22 = vadd.f32 %v903_v54, %v902_v15  ;;  %v912_v17 = vrot.slane %v911_v61, 1 }
 0x1bf   : > { %v913_v47 = vadd.f32 %v912_v17, %v911_v61  ;;  %v916_v2 = vsel %vm915_vm11, %v888_v16, %v904_v22 }
 0x1c0   : > { %v917_v21 = vadd.f32 %v916_v2, %v914_v19  ;;  %937 = sbr.rel (!%p1450_p6) target bundleno = 456 (0x1c8), region = 94 }
 0x1c1   : > { %v920_v23 = vsel %vm915_vm11, %v897_v0, %v913_v47 }
 0x1c2   : > { %918 = vst [vmem:[%s1475_s29] sm:$0x3] %v917_v21  ;;  %v921_v18 = vadd.f32 %v920_v23, %v919_v48  ;;  %s941_s29 = scalar_lea.vmem (%p1450_p6), %s1869_s7, %s1186_s28 }
 0x1c3   : > { %977 = vst [vmem:[%s941_s29] sm:$0xff] (%p1450_p6), %v976_v24 }
 0x1c4   : > { %922 = vst [vmem:[%s1480_s21] sm:$0x3] %v921_v18 }
 0x1c5   : > { %979 = vst [vmem:[%s941_s29 + $0x10] sm:$0xff] %v978_v58 }
 0x1c6   : > { %981 = vst [vmem:[%s941_s29 + $0x20] sm:$0xff] %v980_v25 }
 0x1c7   : > { %983 = vst [vmem:[%s941_s29 + $0x30] sm:$0xff] %v982_v55 }
 0x1c8 PF: > { %s20_s15 = sadd.s32 1, %s1348_s15   ;;  %s1905_s20 = sld [smem:[#allocation4_spill]] }
 0x1c9   : > { %p17_p0 = scmp.ge.s32.totalorder %s20_s15, 6   ;;  %s1906_s21 = sld [smem:[#allocation5_spill]] }
 0x1ca   : > { %s1907_s30 = smov %s1328_s10  ;;  %s1908_s10 = smov %s1458_s24 }
 0x1cb   : > { %s1909_s11 = smov %s1340_s13  ;;  %s1910_s12 = smov %s1344_s14 }
 0x1cc   :  { %19 = sbr.rel (!%p17_p0) target bundleno = 6 (0x6), region = 187 }
 0x1ce   : > { %s1911_s13 = smov %s1905_s20 }
 0x1cf   : > { %s1912_s14 = smov %s1906_s21 }

</bundles_post_ra>
